<compile_context>
chip_gen: v7x
topology: tpu7x:2x2x1
jax: 0.10.0
libtpu: 0.0.40
codegen_flags: <defaults>
</compile_context>

<pallas_src>
import numpy as np
import jax
import jax.numpy as jnp
from jax.experimental import pallas as pl
from jax.experimental.pallas import tpu as pltpu


OUT_FEATURES = 10
OUT_PAD = 128          # lane-dense output width (multiple of 128)


def adjacency_images(img_size: int) -> np.ndarray:
    """Spectral-GCN adjacency over an image grid (Knyazev GNN tutorial style)."""
    col, row = np.meshgrid(np.arange(img_size), np.arange(img_size))
    coord = np.stack((col, row), axis=2).reshape(-1, 2) / float(img_size)  # (N, 2)
    diff = coord[:, None, :] - coord[None, :, :]
    dist = np.sqrt((diff ** 2).sum(-1))
    sigma = 0.05 * np.pi
    A = np.exp(-dist / sigma ** 2)
    A[A < 0.01] = 0.0
    # Kipf & Welling symmetric normalization
    D = A.sum(1)
    D_hat = (D + 1e-5) ** (-0.5)
    A_hat = D_hat[:, None] * A * D_hat[None, :]
    A_hat[A_hat > 0.0001] = A_hat[A_hat > 0.0001] - 0.2
    return A_hat.astype(np.float32)


def prepare_fused_matrix(A, W) -> jax.Array:
    """One-time host-side fold of the constant adjacency + FC weight.

    out = (x @ A^T) @ W^T == x @ (W @ A)^T, so M = pad((W @ A)^T) of shape
    (N, OUT_PAD), stored in bf16 (MXU-native, halves the resident VMEM bytes).
    """
    A = np.asarray(A, dtype=np.float32)
    W = np.asarray(W, dtype=np.float32)
    M = (W @ A).T                                           # (N, 10), f32 on host
    M = np.pad(M, ((0, 0), (0, OUT_PAD - OUT_FEATURES)))    # (N, 128)
    return jnp.asarray(M, dtype=jnp.bfloat16)


def _gcn_kernel(x_ref, m_ref, o_ref):
    # x_ref: (TB, N) f32   m_ref: (N, OUT_PAD) bf16   o_ref: (TB, OUT_PAD) bf16
    # Cast x to bf16 in-kernel (free VPU work on a DMA-bound kernel), one MXU
    # GEMM with f32 accumulation, bf16 lane-dense store.
    acc = jnp.dot(x_ref[...].astype(jnp.bfloat16), m_ref[...],
                  preferred_element_type=jnp.float32)
    o_ref[...] = acc.astype(o_ref.dtype)


def gcn_spectral_forward(x_nchw, m_fused_bf16, *, block_b=2048):
    """out = fc(A @ x_flat) with M = (W @ A)^T pre-folded (see prepare_fused_matrix).

    x_nchw: (B, 1, H, W) with H*W == N; m_fused_bf16: (N, OUT_PAD) bf16.
    """
    B = x_nchw.shape[0]
    N = m_fused_bf16.shape[0]
    x_flat = x_nchw.reshape(B, N).astype(jnp.float32)   # same as torch x.view(B, -1)

    # Batch tiling: single full block for small B; otherwise TB ~= cdiv(B, n_steps)
    # rounded up to the 8-sublane multiple so B_pad - B stays small.
    if B <= block_b:
        TB, B_pad = B, B
    else:
        n_steps = -(-B // block_b)                   # cdiv
        TB = -(-(-(-B // n_steps)) // 8) * 8         # round_up(cdiv(B, n_steps), 8)
        B_pad = n_steps * TB
        if B_pad != B:
            x_flat = jnp.pad(x_flat, ((0, B_pad - B), (0, 0)))
    grid = (B_pad // TB,)

    cost = pl.CostEstimate(
        flops=2 * B_pad * N * OUT_PAD,
        transcendentals=0,
        bytes_accessed=B_pad * N * 4 + N * OUT_PAD * 2 + B_pad * OUT_PAD * 2,
    )

    out = pl.pallas_call(
        _gcn_kernel,
        out_shape=jax.ShapeDtypeStruct((B_pad, OUT_PAD), jnp.bfloat16),
        grid=grid,
        in_specs=[
            # Per-step batch tile of x (f32 straight from HBM; cast in-kernel).
            pl.BlockSpec((TB, N), lambda i: (i, 0)),
            # Fused weights: constant index_map -> VMEM-resident; single buffer
            # (double-buffering a constant block is wasted VMEM headroom).
            pl.BlockSpec((N, OUT_PAD), lambda i: (0, 0),
                         pipeline_mode=pl.Buffered(1)),
        ],
        out_specs=pl.BlockSpec((TB, OUT_PAD), lambda i: (i, 0)),
        compiler_params=pltpu.CompilerParams(
            dimension_semantics=("parallel",)),
        cost_estimate=cost,
    )(x_flat, m_fused_bf16)

    return out[:B, :OUT_FEATURES]


if __name__ == "__main__":
    img_size = 16          # small spatial size (module default is 28)
    N = img_size ** 2      # 256 graph nodes
    B = 2                  # batch

    key = jax.random.PRNGKey(0)
    kx, kw = jax.random.split(key)

    # Input in NCHW, single channel (MNIST-like), as the forward implies.
    x = jax.random.normal(kx, (B, 1, img_size, img_size), dtype=jnp.float32)

    # nn.Linear(N, 10, bias=False) default init: U(-1/sqrt(N), 1/sqrt(N)).
    bound = 1.0 / np.sqrt(N)
    W = jax.random.uniform(kw, (10, N), minval=-bound, maxval=bound,
                           dtype=jnp.float32)

    # Fixed (non-trainable) adjacency buffer; fold with W once on the host.
    A_np = adjacency_images(img_size)
    M = prepare_fused_matrix(A_np, np.asarray(W))          # (N, 128) bf16, cached

    out = gcn_spectral_forward(x, M)
    out = jax.block_until_ready(out)

    # Plain-JAX f32 reference in the original op order: bmm(A, x) then Linear.
    x_flat = x.reshape(B, N)
    A = jnp.asarray(A_np)
    ref = (x_flat @ A.T) @ W.T
    assert out.shape == (B, 10)
    # Tolerance absorbs bf16 weights/activations + bf16 output store
    # (values are O(0.3); bf16 rounding error here is ~1e-3 absolute).
    np.testing.assert_allclose(np.asarray(out, dtype=np.float32),
                               np.asarray(ref),
                               rtol=2e-2, atol=2e-2)

    print("KERNEL_OK")
</pallas_src>

<mosaic_0001>
module attributes {stable_mosaic.version = 11 : i64} {
  func.func @_gcn_kernel(%arg0: i32, %arg1: memref<2x256xf32, #tpu.memory_space<vmem>>, %arg2: memref<256x128xbf16, #tpu.memory_space<vmem>>, %arg3: memref<2x128xbf16, #tpu.memory_space<vmem>>) attributes {dimension_semantics = [#tpu.dimension_semantics<parallel>], iteration_bounds = array<i64: 1>, scalar_prefetch = 0 : i64, scratch_operands = 0 : i64, tpu.core_type = #tpu.core_type<tc>, window_params = [{transform_indices = @transform_0, window_bounds = array<i64: 2, 256>}, {pipeline_mode = #tpu.pipeline_mode<synchronous>, transform_indices = @transform_1, window_bounds = array<i64: 256, 128>}, {transform_indices = @transform_2, window_bounds = array<i64: 2, 128>}]} {
    %c0 = arith.constant 0 : index
    %c0_0 = arith.constant 0 : index
    %0 = vector.load %arg1[%c0, %c0_0] : memref<2x256xf32, #tpu.memory_space<vmem>>, vector<2x256xf32>
    %1 = arith.truncf %0 : vector<2x256xf32> to vector<2x256xbf16>
    %c0_1 = arith.constant 0 : index
    %c0_2 = arith.constant 0 : index
    %2 = vector.load %arg2[%c0_1, %c0_2] : memref<256x128xbf16, #tpu.memory_space<vmem>>, vector<256x128xbf16>
    %cst = arith.constant dense<0.000000e+00> : vector<2x128xf32>
    %3 = tpu.matmul %1, %2, %cst {dimension_numbers = #tpu.dot_dimension_numbers<[1], [0], [0], [1], [0, 0, 1, 1], [], []>} : vector<2x256xbf16>, vector<256x128xbf16>, vector<2x128xf32> -> vector<2x128xf32>
    %4 = arith.truncf %3 : vector<2x128xf32> to vector<2x128xbf16>
    %c0_3 = arith.constant 0 : index
    %c0_4 = arith.constant 0 : index
    %5 = vector.load %arg3[%c0_3, %c0_4] : memref<2x128xbf16, #tpu.memory_space<vmem>>, vector<2x128xbf16>
    tpu.vector_store %arg3[%c0_3, %c0_4], %4 {strides = array<i32>} : memref<2x128xbf16, #tpu.memory_space<vmem>>, vector<2x128xbf16>,
    return
  }
  func.func @transform_0(%arg0: i32) -> (i32, i32) {
    %c0_i32 = arith.constant 0 : i32
    %c0_i32_0 = arith.constant 0 : i32
    return %arg0, %c0_i32 : i32, i32
  }
  func.func @transform_1(%arg0: i32) -> (i32, i32) {
    %c0_i32 = arith.constant 0 : i32
    %c0_i32_0 = arith.constant 0 : i32
    %c0_i32_1 = arith.constant 0 : i32
    return %c0_i32, %c0_i32_0 : i32, i32
  }
  func.func @transform_2(%arg0: i32) -> (i32, i32) {
    %c0_i32 = arith.constant 0 : i32
    %c0_i32_0 = arith.constant 0 : i32
    return %arg0, %c0_i32 : i32, i32
  }
}

</mosaic_0001>

<bundles_post_ra>
// kernel: tpu_custom_call.1
= control target key start
LH: loop header
LB: loop body
LE: loop exit
PB: predicated region body
PF: predicated region fallthrough
CT: control target
= control target key end

     0   :  { %7 = vsyncpa [#allocation3], 0  ;;  %s434_s0 = inlined_call_operand.hbm [shape: f32[2,256], index: 0, kind: input, shape index: {}]   ;;  %s435_s1 = inlined_call_operand.hbm [shape: bf16[256,128], index: 1, kind: input, shape index: {}]   ;;  %s436_s2 = inlined_call_operand.hbm [shape: bf16[2,128], index: 2, kind: output, shape index: {}]  }
   0x1   :  { %8 = vsyncpa [#allocation6], 0 }
   0x2   :  { %9 = vsyncpa [#allocation4], 0  ;;  %s371_s9 = smov [#allocation2]   ;;  %s372_s11 = smov [#allocation5]  }
   0x3   :  { %s16_s10 = sshll.u32 %s371_s9, 4  ;;  %s25_s12 = sshll.u32 %s372_s11, 4  ;;  %s17_s10 = int_to_ptr.vmem [resolvable:$true] %s16_s10  ;;  %s391_s12 = int_to_ptr.vmem [resolvable:$true] %s25_s12 }
   0x4   :  { %s299_s15 = scalar_lea.hbm %s434_s0, 64 }
   0x5   :  { %p300_p0 = scmp.ne.s32.totalorder %s434_s0, %s299_s15  ;;  %p303_p1 = scmp.lt.u32.totalorder %s299_s15, %s434_s0 }
   0x7   :  { %p305_p2 = pnand %p303_p1, %p300_p0 }
   0x9   :  { %308 = shalt.err (!%p305_p2)
}
   0xa   :  { %s309_s20 = scalar_lea.vmem %s17_s10, 64  ;;  %p314_p4 = scmp.lt.s32.totalorder %s17_s10, %s17_s10 }
   0xb   :  { %p310_p3 = scmp.ne.s32.totalorder %s17_s10, %s309_s20  ;;  %p315_p5 = scmp.lt.s32.totalorder %s309_s20, %s309_s20 }
   0xd   :  { %p316_p6 = por %p315_p5, %p314_p4 }
   0xf   :  { %p317_p7 = pnand %p316_p6, %p310_p3 }
  0x11   :  { %320 = shalt.err (!%p317_p7)
}
  0x12   :  { %19 = dma.hbm_to_vmem [thread:$0]  %s434_s0, 64, %s17_s10, [#allocation3]  }
  0x13   :  { %s321_s25 = scalar_lea.hbm %s435_s1, 2048 }
  0x14   :  { %p322_p8 = scmp.ne.s32.totalorder %s435_s1, %s321_s25  ;;  %p325_p9 = scmp.lt.u32.totalorder %s321_s25, %s435_s1 }
  0x16   :  { %p327_p10 = pnand %p325_p9, %p322_p8 }
  0x18   :  { %330 = shalt.err (!%p327_p10)
}
  0x19   :  { %s331_s30 = scalar_lea.vmem %s391_s12, 2048  ;;  %p336_p12 = scmp.lt.s32.totalorder %s391_s12, %s391_s12 }
  0x1a   :  { %p332_p11 = scmp.ne.s32.totalorder %s391_s12, %s331_s30  ;;  %p337_p13 = scmp.lt.s32.totalorder %s331_s30, %s331_s30 }
  0x1c   :  { %p338_p0 = por %p337_p13, %p336_p12 }
  0x1e   :  { %p339_p1 = pnand %p338_p0, %p332_p11 }
  0x20   :  { %342 = shalt.err (!%p339_p1)
}
  0x21   :  { %s373_s0 = smov 64   ;;  %s374_s3 = smov 4  }
  0x22   :  { %31 = dma.hbm_to_vmem [thread:$0]  %s435_s1, 2048, %s391_s12, [#allocation6], %s373_s0, %s373_s0, %s374_s3  }
  0x23   :  { %365 = dma.done.wait [#allocation3], 64  }
  0x24   :  { %366 = vsyncadd [#allocation3], 4294967232 }
  0x25   :  { %367 = dma.done.wait [#allocation6], 2048  }
  0x26   :  { %368 = vsyncadd [#allocation6], 4294965248  ;;  %v283_v0 = vld [vmem:[#allocation5 + $0x40] sm:$0xff]   ;;  %v285_v2 = vld [vmem:[#allocation5 + $0x48] sm:$0xff]   ;;  %s375_s1 = smov [#allocation7]  }
  0x27   :  { %v284_v1 = vld [vmem:[#allocation5] sm:$0xff]   ;;  %256 = vmatprep.subr.bf16.mxu0 %v283_v0  ;;  %v286_v3 = vld [vmem:[#allocation5 + $0x8] sm:$0xff]   ;;  %v287_v4 = vld [vmem:[#allocation5 + $0x50] sm:$0xff]   ;;  %s229_s6 = sshll.u32 %s375_s1, 4  ;;  %s230_s6 = int_to_ptr.vmem [resolvable:$true] %s229_s6 }
  0x28   :  { %257 = vmatpush3.bf16.msra.mxu0 %v284_v1  ;;  %v288_v5 = vld [vmem:[#allocation5 + $0x10] sm:$0xff]   ;;  %v289_v6 = vld [vmem:[#allocation5 + $0x58] sm:$0xff]   ;;  %v291_v8 = vld [vmem:[#allocation5 + $0x60] sm:$0xff]   ;;  %s343_s7 = scalar_lea.vmem %s230_s6, 16  ;;  %s347_s8 = scalar_lea.vmem %s230_s6, 32 }
  0x29   :  { %258 = vmatprep.subr.bf16.mxu0 %v285_v2  ;;  %v290_v7 = vld [vmem:[#allocation5 + $0x18] sm:$0xff]   ;;  %v292_v9 = vld [vmem:[#allocation5 + $0x20] sm:$0xff]   ;;  %v293_v10 = vld [vmem:[#allocation5 + $0x68] sm:$0xff]   ;;  %p344_p2 = scmp.ne.s32.totalorder %s230_s6, %s343_s7  ;;  %p348_p3 = scmp.lt.s32.totalorder %s230_s6, %s230_s6 }
  0x2a   :  { %v239_v11 = vld.sshfl [vmem:[#allocation2] sm:$0x33 pattern:$0x76325410]  ;;  %v294_v13 = vld [vmem:[#allocation5 + $0x28] sm:$0xff]   ;;  %v295_v15 = vld [vmem:[#allocation5 + $0x70] sm:$0xff]   ;;  %p349_p4 = scmp.lt.s32.totalorder %s347_s8, %s343_s7 }
  0x2b   :  { %v48_v12 = vcombine.high %v239_v11, %v239_v11  ;;  %v296_v16 = vld [vmem:[#allocation5 + $0x30] sm:$0xff]   ;;  %v297_v17 = vld [vmem:[#allocation5 + $0x78] sm:$0xff]   ;;  %v51_v19 = vpack.c.bf16 %v239_v11, %v239_v11 }
  0x2c   :  { %259 = vmatpush3.bf16.msra.mxu0 %v286_v3  ;;  %v298_v18 = vld [vmem:[#allocation5 + $0x38] sm:$0xff]   ;;  %p350_p5 = por %p349_p4, %p348_p3 }
  0x2d   :  { %260 = vmatprep.subr.bf16.mxu0 %v287_v4  ;;  %v52_v14 = vpack.c.bf16 %v48_v12, %v48_v12 }
  0x2e   :  { %p351_p6 = pnand %p350_p5, %p344_p2 }
  0x2f   :  { %213 = vmatprep.mubr.bf16.mxu0 %v52_v14 }
  0x30   :  { %261 = vmatpush3.bf16.msra.mxu0 %v288_v5 }
  0x31   :  { %262 = vmatprep.subr.bf16.mxu0 %v289_v6 }
  0x34   :  { %263 = vmatpush3.bf16.msra.mxu0 %v290_v7 }
  0x35   :  { %264 = vmatprep.subr.bf16.mxu0 %v291_v8 }
  0x38   :  { %265 = vmatpush3.bf16.msra.mxu0 %v292_v9 }
  0x39   :  { %266 = vmatprep.subr.bf16.mxu0 %v293_v10 }
  0x3c   :  { %267 = vmatpush3.bf16.msra.mxu0 %v294_v13 }
  0x3d   :  { %268 = vmatprep.subr.bf16.mxu0 %v295_v15 }
  0x40   :  { %269 = vmatpush3.bf16.msra.mxu0 %v296_v16 }
  0x41   :  { %270 = vmatprep.subr.bf16.mxu0 %v297_v17 }
  0x44   :  { %271 = vmatpush3.bf16.msra.mxu0 %v298_v18 }
  0x47   :  { %214 = vmatmul.mubr.bf16.vlgmr.msra.gmra.mrb[0].mxu0 %v51_v19 }
 0x11a   :  { %v272_v20 = vpop.f32.mrb[0].mxu0 }
 0x11b   :  { %v273_v21 = vpop.f32.mrb[1].mxu0 }
 0x11c   :  { %v274_v22 = vadd.f32 %v273_v21, %v272_v20  ;;  %v275_v23 = vpop.f32.mrb[2].mxu0 }
 0x11d   :  { %v276_v24 = vpop.f32.mrb[3].mxu0 }
 0x11e   :  { %v221_v25 = vpack.c.bf16 %v274_v22, %v274_v22 }
 0x120   :  { %222 = vst [vmem:[#allocation7] sm:$0x1] %v221_v25 }
 0x121   :  { %354 = shalt.err (!%p351_p6)
}
 0x122   :  { %s355_s11 = scalar_lea.hbm %s436_s2, 16 }
 0x123   :  { %p356_p7 = scmp.ne.s32.totalorder %s436_s2, %s355_s11  ;;  %p359_p8 = scmp.lt.u32.totalorder %s355_s11, %s436_s2 }
 0x125   :  { %p361_p9 = pnand %p359_p8, %p356_p7 }
 0x127   :  { %364 = shalt.err (!%p361_p9)
}
 0x128   :  { %232 = dma.vmem_to_hbm [thread:$0]  %s230_s6, 16, %s436_s2, [#allocation4]  }
 0x129   :  { %369 = dma.done.wait [#allocation4], 16  }
 0x12a   :  { %370 = vsyncadd [#allocation4], 4294967280 }
 0x12b   :  { %236 = vsyncpa [#allocation3], 1 }
 0x12c   :  { %237 = vsyncpa [#allocation6], 1 }
 0x12d   :  { %238 = vsyncpa [#allocation4], 1 }

</bundles_post_ra>
